<compile_context>
chip_gen: v7x
topology: tpu7x:2x2x1
jax: 0.10.0
libtpu: 0.0.40
codegen_flags: <defaults>
</compile_context>

<pallas_src>
import functools
import math

import jax
import jax.numpy as jnp
from jax.experimental import pallas as pl
from jax.experimental.pallas import tpu as pltpu


def _round_up(value, multiple):
    return ((value + multiple - 1) // multiple) * multiple


def _vmem_capacity_bytes():
    """Per-core VMEM capacity; conservative 64 MiB (v7x per-TC) fallback."""
    try:
        info = pltpu.get_tpu_info()
        cap = getattr(info, "vmem_capacity_bytes", None)
        if cap:
            return int(cap)
    except Exception:
        pass
    return 64 << 20


def _spec(shape, index_map, buffer_count=None):
    """BlockSpec, optionally with an explicit pipeline buffer count."""
    if buffer_count is None:
        return pl.BlockSpec(shape, index_map)
    try:
        return pl.BlockSpec(shape, index_map,
                            pipeline_mode=pl.Buffered(buffer_count))
    except TypeError:  # older jax without pipeline_mode: default buffering
        return pl.BlockSpec(shape, index_map)


def siren_kernel(x_ref, w_ref, b_ref, o_ref):
    """One (tile_n, tile_fout) output tile: sin(x @ (omega*W^T) + omega*b)."""
    # TODO(synk): for tiny F_in (e.g. the 2-3 coordinate inputs of the first
    # SIREN layer) a VPU broadcast-FMA path would beat this short-K MXU pass.
    z = jnp.dot(x_ref[...], w_ref[...], preferred_element_type=jnp.float32)
    o_ref[...] = jnp.sin(z + b_ref[...]).astype(o_ref.dtype)


@functools.partial(jax.jit, static_argnames=("tile_n", "tile_fout", "out_dtype"))
def siren_layer(x, weight, bias, omega_0, *, tile_n=1024, tile_fout=None,
                out_dtype=None):
    """SIREN layer forward: sin(omega_0 * (x @ W^T + b)).

    x: (..., F_in), weight: (F_out, F_in) (PyTorch nn.Linear layout),
    bias: (F_out,).  Returns shape (..., F_out) in out_dtype (default x.dtype).
    """
    *lead, f_in = x.shape
    f_out, f_in_w = weight.shape
    assert f_in == f_in_w, "feature-dimension mismatch between x and weight"
    n = math.prod(lead)
    out_dtype = jnp.dtype(out_dtype) if out_dtype is not None else x.dtype
    x2 = x.reshape(n, f_in)

    # Fold omega_0 and the transpose into the tiny weight/bias prep:
    #   sin(omega*(x @ W^T + b)) == sin(x @ (omega*W^T) + omega*b)
    omega = jnp.asarray(omega_0, jnp.float32)
    w_t = (weight.astype(jnp.float32) * omega).T.astype(x2.dtype)  # (F_in, F_out)
    b_s = (bias.astype(jnp.float32) * omega).reshape(1, f_out)     # f32 bias

    x_it = x2.dtype.itemsize
    w_it = w_t.dtype.itemsize
    o_it = out_dtype.itemsize

    # ---- capacity-aware tiling ----------------------------------------------
    cap = _vmem_capacity_bytes()
    budget = int(cap * 0.75)  # leave headroom for Mosaic internal scratch

    if tile_fout is None:
        tile_fout_eff = _round_up(f_out, 128)          # whole W resident if it fits
        while tile_fout_eff > 128 and f_in * tile_fout_eff * w_it > budget // 2:
            tile_fout_eff = _round_up(tile_fout_eff // 2, 128)
    else:
        tile_fout_eff = _round_up(max(int(tile_fout), 128), 128)

    tile_n_eff = _round_up(min(max(int(tile_n), 8), _round_up(n, 8)), 8)

    def footprint(tn):
        return (2 * tn * f_in * x_it                    # x tile (double-buffered)
                + f_in * tile_fout_eff * w_it           # W slab (single-buffered)
                + 8 * tile_fout_eff * 4                 # bias row (sublane-padded)
                + 2 * tn * tile_fout_eff * o_it)        # out tile (double-buffered)

    while tile_n_eff > 8 and footprint(tile_n_eff) > budget:
        tile_n_eff = max(8, _round_up(tile_n_eff // 2, 8))

    n_fout_tiles = pl.cdiv(f_out, tile_fout_eff)
    f_out_pad = n_fout_tiles * tile_fout_eff
    # Only the small W / bias get padded (lane-dense F_out axis); x is untouched.
    w_p = jnp.pad(w_t, ((0, 0), (0, f_out_pad - f_out)))
    b_p = jnp.pad(b_s, ((0, 0), (0, f_out_pad - f_out)))

    # Grid: (F_out tiles, N tiles); the W block index is constant across the
    # inner N loop so the slab is fetched once per F_out tile.  Ragged last
    # blocks along N and F_out are clipped by the pipeline DMAs.
    grid = (n_fout_tiles, pl.cdiv(n, tile_n_eff))

    vmem_limit = int(min(cap, max(footprint(tile_n_eff) + (8 << 20), 32 << 20)))

    out = pl.pallas_call(
        siren_kernel,
        out_shape=jax.ShapeDtypeStruct((n, f_out), out_dtype),
        grid_spec=pltpu.PrefetchScalarGridSpec(
            num_scalar_prefetch=0,
            grid=grid,
            in_specs=[
                _spec((tile_n_eff, f_in), lambda j, i: (i, 0)),      # x rows
                _spec((f_in, tile_fout_eff), lambda j, i: (0, j),
                      buffer_count=1),                               # omega * W^T
                _spec((1, tile_fout_eff), lambda j, i: (0, j),
                      buffer_count=1),                               # omega * b
            ],
            out_specs=pl.BlockSpec((tile_n_eff, tile_fout_eff),
                                   lambda j, i: (i, j)),
        ),
        compiler_params=pltpu.CompilerParams(
            # Megacore (v7x) shards the N axis -> x streamed once per chip.
            dimension_semantics=("arbitrary", "parallel"),
            vmem_limit_bytes=vmem_limit,
        ),
        cost_estimate=pl.CostEstimate(
            flops=2 * n * f_in * f_out,
            transcendentals=n * f_out,
            bytes_accessed=n * f_in * x_it + n * f_out * o_it + f_in * f_out * w_it,
        ),
    )(x2, w_p, b_p)

    return out.reshape(*lead, f_out)


def reference_siren(x, weight, bias, omega_0):
    return jnp.sin(omega_0 * (x @ weight.T + bias))


if __name__ == "__main__":
    key = jax.random.PRNGKey(0)
    omega_0 = 30.0

    def make_case(case_key, lead, f_in, f_out):
        k_x, k_w, k_b = jax.random.split(case_key, 3)
        bound = 1.0 / jnp.sqrt(jnp.float32(f_in))
        w = jax.random.uniform(k_w, (f_out, f_in), jnp.float32, -bound, bound)
        b = jax.random.uniform(k_b, (f_out,), jnp.float32, -bound, bound)
        xx = jax.random.normal(k_x, (*lead, f_in), jnp.float32)
        return xx, w, b

    cases = [
        ((16,), 32, 32, {}, 2e-4),                                  # single tile
        ((3, 10), 48, 40, {}, 2e-4),                                # ragged N + extra lead dim
        ((40,), 24, 160, dict(tile_n=16, tile_fout=128), 2e-4),     # multi-tile 2-D grid
        ((64,), 32, 48, dict(out_dtype=jnp.bfloat16), 1e-2),        # bf16 output path
    ]
    keys = jax.random.split(key, len(cases))
    for case_key, (lead, f_in, f_out, kw, tol) in zip(keys, cases):
        x, w, b = make_case(case_key, lead, f_in, f_out)
        out = jax.block_until_ready(siren_layer(x, w, b, omega_0, **kw))
        ref = reference_siren(x, w, b, omega_0)
        assert out.shape == ref.shape, (out.shape, ref.shape)
        err = float(jnp.max(jnp.abs(out.astype(jnp.float32) - ref)))
        assert err < tol, f"mismatch vs reference: max abs err {err} (tol {tol})"

    print("KERNEL_OK")
</pallas_src>

<mosaic_0001>
module attributes {stable_mosaic.version = 11 : i64} {
  func.func @siren_kernel(%arg0: i32, %arg1: i32, %arg2: memref<16x32xf32, #tpu.memory_space<vmem>>, %arg3: memref<32x128xf32, #tpu.memory_space<vmem>>, %arg4: memref<1x128xf32, #tpu.memory_space<vmem>>, %arg5: memref<16x128xf32, #tpu.memory_space<vmem>>) attributes {dimension_semantics = [#tpu.dimension_semantics<arbitrary>, #tpu.dimension_semantics<parallel>], iteration_bounds = array<i64: 1, 1>, scalar_prefetch = 0 : i64, scratch_operands = 0 : i64, tpu.core_type = #tpu.core_type<tc>, window_params = [{transform_indices = @transform_0, window_bounds = array<i64: 16, 32>}, {pipeline_mode = #tpu.pipeline_mode<synchronous>, transform_indices = @transform_1, window_bounds = array<i64: 32, 128>}, {pipeline_mode = #tpu.pipeline_mode<synchronous>, transform_indices = @transform_2, window_bounds = array<i64: 1, 128>}, {transform_indices = @transform_3, window_bounds = array<i64: 16, 128>}]} {
    %c0 = arith.constant 0 : index
    %c0_0 = arith.constant 0 : index
    %0 = vector.load %arg2[%c0, %c0_0] : memref<16x32xf32, #tpu.memory_space<vmem>>, vector<16x32xf32>
    %c0_1 = arith.constant 0 : index
    %c0_2 = arith.constant 0 : index
    %1 = vector.load %arg3[%c0_1, %c0_2] : memref<32x128xf32, #tpu.memory_space<vmem>>, vector<32x128xf32>
    %cst = arith.constant dense<0.000000e+00> : vector<16x128xf32>
    %2 = tpu.matmul %0, %1, %cst {dimension_numbers = #tpu.dot_dimension_numbers<[1], [0], [0], [1], [0, 0, 1, 1], [], []>} : vector<16x32xf32>, vector<32x128xf32>, vector<16x128xf32> -> vector<16x128xf32>
    %c0_3 = arith.constant 0 : index
    %c0_4 = arith.constant 0 : index
    %3 = vector.load %arg4[%c0_3, %c0_4] : memref<1x128xf32, #tpu.memory_space<vmem>>, vector<1x128xf32>
    %4 = vector.broadcast %3 : vector<1x128xf32> to vector<16x128xf32>
    %5 = arith.addf %2, %4 : vector<16x128xf32>
    %6 = math.sin %5 : vector<16x128xf32>
    %c0_5 = arith.constant 0 : index
    %c0_6 = arith.constant 0 : index
    %7 = vector.load %arg5[%c0_5, %c0_6] : memref<16x128xf32, #tpu.memory_space<vmem>>, vector<16x128xf32>
    tpu.vector_store %arg5[%c0_5, %c0_6], %6 {strides = array<i32>} : memref<16x128xf32, #tpu.memory_space<vmem>>, vector<16x128xf32>,
    return
  }
  func.func @transform_0(%arg0: i32, %arg1: i32) -> (i32, i32) {
    %c0_i32 = arith.constant 0 : i32
    %c0_i32_0 = arith.constant 0 : i32
    return %arg1, %c0_i32 : i32, i32
  }
  func.func @transform_1(%arg0: i32, %arg1: i32) -> (i32, i32) {
    %c0_i32 = arith.constant 0 : i32
    %c0_i32_0 = arith.constant 0 : i32
    return %c0_i32, %arg0 : i32, i32
  }
  func.func @transform_2(%arg0: i32, %arg1: i32) -> (i32, i32) {
    %c0_i32 = arith.constant 0 : i32
    %c0_i32_0 = arith.constant 0 : i32
    return %c0_i32, %arg0 : i32, i32
  }
  func.func @transform_3(%arg0: i32, %arg1: i32) -> (i32, i32) {
    %c0_i32 = arith.constant 0 : i32
    return %arg1, %arg0 : i32, i32
  }
}

</mosaic_0001>

<bundles_post_ra>
// kernel: siren_layer.1
= control target key start
LH: loop header
LB: loop body
LE: loop exit
PB: predicated region body
PF: predicated region fallthrough
CT: control target
= control target key end

     0   :  { %vm28_vm0 = vcmask 261120   ;;  %s545_s0 = inlined_call_operand.vmem [shape: f32[16,32], index: 0, kind: input, shape index: {}]   ;;  %s546_s1 = inlined_call_operand.vmem [shape: f32[32,128], index: 1, kind: input, shape index: {}]   ;;  %s547_s2 = inlined_call_operand.vmem [shape: f32[1,128], index: 2, kind: input, shape index: {}]   ;;  %s548_s3 = inlined_call_operand.hbm [shape: f32[16,32], index: 3, kind: output, shape index: {}]  }
   0x1   :  { %v17_v0 = vld [vmem:[%s546_s1] sm:$0xff]  ;;  %v18_v1 = vld [vmem:[%s546_s1 + $0x8] sm:$0xff]  ;;  %v19_v2 = vld [vmem:[%s546_s1 + $0x10] sm:$0xff] }
   0x2   :  { %v364_v3 = vpack.c.bf16 %v18_v1, %v17_v0  ;;  %v20_v4 = vld [vmem:[%s546_s1 + $0x18] sm:$0xff]  ;;  %v15_v5 = vld [vmem:[%s545_s0] sm:$0xff] }
   0x3   :  { %v368_v6 = vpack.c.bf16 %v20_v4, %v19_v2  ;;  %361 = vmatprep.mubr.msk.f32.mxu0 %vm28_vm0, %v15_v5 }
   0x4   :  { %8 = vsyncpa [#allocation3], 0  ;;  %365 = vmatprep.subr.bf16.mxu0 %v364_v3  ;;  %v16_v7 = vld [vmem:[%s545_s0 + $0x8] sm:$0xff]  ;;  %v336_v8 = vld [vmem:[%s547_s2] ss:$0 sm:$0xff]  ;;  %s427_s0 = smov [#allocation2]  }
   0x5   :  { %367 = vmatpush3.bf16.msra.mxu0 %v364_v3  ;;  %v421_v33 = vmov 683565275   ;;  %v422_v37 = vmov 2475754826   ;;  %v423_v39 = vmov 2131351028  }
   0x6   :  { %369 = vmatprep.subr.bf16.mxu0 %v368_v6  ;;  %v424_v41 = vmov 2102212464   ;;  %v425_v43 = vmov 920167782   ;;  %v426_v50 = vmov 1326507024  }
   0x7   :  { %s325_s1 = sshll.u32 %s427_s0, 4  ;;  %s326_s1 = int_to_ptr.vmem [resolvable:$true] %s325_s1 }
   0x8   :  { %s397_s2 = scalar_lea.vmem %s326_s1, 256  ;;  %p402_p1 = scmp.lt.s32.totalorder %s326_s1, %s326_s1 }
   0x9   :  { %371 = vmatpush3.bf16.msra.mxu0 %v368_v6  ;;  %p398_p0 = scmp.ne.s32.totalorder %s326_s1, %s397_s2  ;;  %p403_p2 = scmp.lt.s32.totalorder %s397_s2, %s397_s2 }
   0xb   :  { %p404_p3 = por %p403_p2, %p402_p1 }
   0xc   :  { %362 = vmatmul.mubr.msk.f32.vlgmr.msra.gmra.mrb[0].mxu0 %vm28_vm0, %v16_v7 }
   0xd   :  { %p405_p4 = pnand %p404_p3, %p398_p0 }
  0xdf   :  { %v363_v9 = vpop.f32.mrb[0].mxu0 }
  0xe0   :  { %v471_v10 = vadd.f32 %v363_v9, %v336_v8  ;;  %v101_v11 = vpop.f32.mrb[1].mxu0 }
  0xe1   :  { %v473_v12 = vadd.f32 %v336_v8, %v101_v11 }
  0xe2   :  { %v214_v13 = vand.u32 2147483647, %v471_v10  ;;  %v217_v14 = vand.u32 2139095040, %v471_v10  ;;  %vm216_vm15 = vcmp.lt.s32.totalorder %v471_v10, 0 }
  0xe3   :  { %v113_v15 = vand.u32 2139095040, %v473_v12  ;;  %v110_v18 = vand.u32 2147483647, %v473_v12 }
  0xe4   :  { %v218_v16 = vshrl.u32 %v217_v14, 23  ;;  %v221_v17 = vand.u32 8388607, %v214_v13  ;;  %vm215_vm0 = vcmp.le.f32.partialorder %v214_v13, 0.7853982 }
  0xe5   :  { %v114_v19 = vshrl.u32 %v113_v15, 23  ;;  %v483_v24 = vand.u32 8388607, %v110_v18 }
  0xe6   :  { %v343_v20 = vadd.s32 4294967169, %v218_v16  ;;  %v222_v23 = vor.u32 8388608, %v221_v17 }
  0xe7   :  { %v339_v21 = vadd.s32 4294967169, %v114_v19  ;;  %v118_v31 = vor.u32 8388608, %v483_v24 }
  0xe8   :  { %v224_v22 = vadd.s32 1, %v343_v20  ;;  %v485_v30 = vshll.u32 %v222_v23, 8 }
  0xe9   :  { %v120_v25 = vadd.s32 1, %v339_v21 }
  0xea   :  { %vm225_vm1 = vcmp.gt.s32.totalorder %v224_v22, 0 }
  0xeb   :  { %v226_v26 = vsel %vm225_vm1, %v224_v22, 0  ;;  %vm121_vm2 = vcmp.gt.s32.totalorder %v120_v25, 0  ;;  %vm112_vm1 = vcmp.lt.s32.totalorder %v473_v12, 0 }
  0xec   :  { %v227_v27 = vshrl.u32 %v226_v26, 5  ;;  %v228_v28 = vand.u32 31, %v226_v26  ;;  %v122_v29 = vsel %vm121_vm2, %v120_v25, 0  ;;  %v158_v25 = vshll.u32 %v118_v31, 8 }
  0xed   :  { %v488_v35 = vshrl.u32 %v122_v29, 5  ;;  %v124_v36 = vand.u32 31, %v122_v29  ;;  %vm111_vm2 = vcmp.le.f32.partialorder %v110_v18, 0.7853982 }
  0xee   :  { %v229_v32 = vsub.s32 32, %v228_v28  ;;  %v231_v34 = vshll.u32 %v421_v33, %v228_v28  ;;  %v234_v38 = vshll.u32 %v422_v37, %v228_v28  ;;  %v237_v40 = vshll.u32 %v423_v39, %v228_v28 }
  0xef   :  { %v240_v42 = vshll.u32 %v424_v41, %v228_v28  ;;  %v243_v44 = vshll.u32 %v425_v43, %v228_v28  ;;  %vm246_vm3 = vcmp.lt.s32.totalorder %v227_v27, 1  ;;  %vm247_vm4 = vcmp.lt.s32.totalorder %v227_v27, 2 }
  0xf0   :  { %v232_v45 = vshrl.u32 %v422_v37, %v229_v32  ;;  %v235_v46 = vshrl.u32 %v423_v39, %v229_v32  ;;  %v238_v47 = vshrl.u32 %v424_v41, %v229_v32  ;;  %v230_v48 = vshrl.u32 %v421_v33, %v229_v32 }
  0xf1   :  { %v241_v49 = vshrl.u32 %v425_v43, %v229_v32  ;;  %v244_v51 = vshrl.u32 %v426_v50, %v229_v32  ;;  %v125_v55 = vsub.s32 32, %v124_v36  ;;  %vm248_vm5 = vcmp.lt.s32.totalorder %v227_v27, 3 }
  0xf2   :  { %v233_v52 = vor.u32 %v232_v45, %v231_v34  ;;  %v236_v53 = vor.u32 %v235_v46, %v234_v38  ;;  %v239_v54 = vor.u32 %v238_v47, %v237_v40  ;;  %vm249_vm6 = vcmp.lt.s32.totalorder %v227_v27, 4 }
  0xf3   :  { %v242_v56 = vor.u32 %v241_v49, %v240_v42  ;;  %v245_v57 = vor.u32 %v244_v51, %v243_v44  ;;  %v127_v1 = vshll.u32 %v421_v33, %v124_v36  ;;  %v128_v4 = vshrl.u32 %v422_v37, %v125_v55 }
  0xf4   :  { %v250_v58 = vsel %vm246_vm3, %v230_v48, %v233_v52  ;;  %v251_v59 = vsel %vm249_vm6, %v239_v54, 2102212464  ;;  %v254_v60 = vsel %vm246_vm3, %v233_v52, %v236_v53  ;;  %v258_v61 = vsel %vm246_vm3, %v236_v53, %v239_v54 }
  0xf5   :  { %v252_v62 = vsel %vm248_vm5, %v236_v53, %v251_v59  ;;  %v255_v63 = vsel %vm249_vm6, %v242_v56, 920167782  ;;  %v259_v0 = vsel %vm249_vm6, %v245_v57, 1326507024  ;;  %v130_v5 = vshll.u32 %v422_v37, %v124_v36 }
  0xf6   :  { %v256_v2 = vsel %vm248_vm5, %v239_v54, %v255_v63  ;;  %v260_v3 = vsel %vm248_vm5, %v242_v56, %v259_v0  ;;  %v253_v6 = vsel %vm247_vm4, %v250_v58, %v252_v62  ;;  %v131_v9 = vshrl.u32 %v423_v39, %v125_v55 }
  0xf7   :  { %v257_v7 = vsel %vm247_vm4, %v254_v60, %v256_v2  ;;  %v261_v8 = vsel %vm247_vm4, %v258_v61, %v260_v3  ;;  %v129_v17 = vor.u32 %v128_v4, %v127_v1  ;;  %v133_v20 = vshll.u32 %v423_v39, %v124_v36 }
  0xf8   :  { %v497_v11 = vmul.u32.u64.low %v485_v30, %v261_v8  ;;  %v498_v14 = vmul.u32.u64.high %v485_v30, %v261_v8, %v497_v11  ;;  %v501_v15 = vmul.u32.u64.low %v485_v30, %v257_v7  ;;  %v502_v16 = vmul.u32.u64.high %v485_v30, %v257_v7, %v501_v15 }
  0xf9   :  { %v132_v19 = vor.u32 %v131_v9, %v130_v5  ;;  %v134_v21 = vshrl.u32 %v424_v41, %v125_v55  ;;  %v136_v22 = vshll.u32 %v424_v41, %v124_v36  ;;  %v137_v23 = vshrl.u32 %v425_v43, %v125_v55 }
  0xfa   :  { %v140_v24 = vshrl.u32 %v426_v50, %v125_v55  ;;  %v269_v26 = vmul.u32 %v485_v30, %v253_v6  ;;  %v126_v27 = vshrl.u32 %v421_v33, %v125_v55  ;;  %v139_v29 = vshll.u32 %v425_v43, %v124_v36 }
  0xfb   :  { %v135_v28 = vor.u32 %v134_v21, %v133_v20  ;;  %vm271_vm7 = vc.u32 %v498_v14, %v501_v15  ;;  %v272_v32 = vadd.s32 1, %v502_v16  ;;  %v138_v34 = vor.u32 %v137_v23, %v136_v22 }
  0xfc   :  { %vm142_vm8 = vcmp.lt.s32.totalorder %v488_v35, 1  ;;  %v141_v37 = vor.u32 %v140_v24, %v139_v29  ;;  %vm144_vm9 = vcmp.lt.s32.totalorder %v488_v35, 3  ;;  %vm145_vm10 = vcmp.lt.s32.totalorder %v488_v35, 4 }
  0xfd   :  { %v150_v38 = vsel %vm142_vm8, %v129_v17, %v132_v19  ;;  %v273_v31 = vsel %vm271_vm7, %v272_v32, %v502_v16  ;;  %v147_v39 = vsel %vm145_vm10, %v135_v28, 2102212464  ;;  %v151_v30 = vsel %vm145_vm10, %v138_v34, 920167782 }
  0xfe   :  { %v154_v33 = vsel %vm142_vm8, %v132_v19, %v135_v28  ;;  %v274_v40 = vadd.s32 %v273_v31, %v269_v26  ;;  %vm143_vm11 = vcmp.lt.s32.totalorder %v488_v35, 2  ;;  %v152_v36 = vsel %vm144_vm9, %v135_v28, %v151_v30 }
  0xff   :  { %v155_v41 = vsel %vm145_vm10, %v141_v37, 1326507024  ;;  %v146_v42 = vsel %vm142_vm8, %v126_v27, %v129_v17  ;;  %v148_v43 = vsel %vm144_vm9, %v132_v19, %v147_v39  ;;  %v153_v44 = vsel %vm143_vm11, %v150_v38, %v152_v36 }
 0x100   :  { %v156_v45 = vsel %vm144_vm9, %v138_v34, %v155_v41  ;;  %v275_v46 = vadd.s32 536870912, %v274_v40  ;;  %v512_v48 = vmul.u32.u64.low %v158_v25, %v153_v44  ;;  %v513_v49 = vmul.u32.u64.high %v158_v25, %v153_v44, %v512_v48 }
 0x101   :  { %v157_v47 = vsel %vm143_vm11, %v154_v33, %v156_v45  ;;  %v149_v53 = vsel %vm143_vm11, %v146_v42, %v148_v43  ;;  %v270_v5 = vadd.s32 %v501_v15, %v498_v14  ;;  %vm306_vm6 = vweird.f32 %v471_v10 }
 0x102   :  { %v515_v50 = vmul.u32.u64.low %v158_v25, %v157_v47  ;;  %v516_v51 = vmul.u32.u64.high %v158_v25, %v157_v47, %v515_v50  ;;  %v276_v52 = vshrl.u32 %v275_v46, 30  ;;  %v168_v55 = vadd.s32 1, %v513_v49 }
 0x103   :  { %v165_v35 = vmul.u32 %v158_v25, %v149_v53  ;;  %vm202_vm10 = vweird.f32 %v473_v12 }
 0x104   :  { %v277_v54 = vshll.u32 %v276_v52, 30  ;;  %vm167_vm12 = vc.u32 %v516_v51, %v512_v48  ;;  %v166_v26 = vadd.s32 %v512_v48, %v516_v51  ;;  %v300_v15 = vsub.s32 4, %v276_v52 }
 0x105   :  { %v169_v57 = vsel %vm167_vm12, %v168_v55, %v513_v49 }
 0x106   :  { %v278_v56 = vsub.s32 %v274_v40, %v277_v54  ;;  %v170_v58 = vadd.s32 %v169_v57, %v165_v35  ;;  %v301_v30 = vsel %vm216_vm15, %v300_v15, %v276_v52 }
 0x107   :  { %v303_v36 = vsel %vm215_vm0, 0, %v301_v30 }
 0x108   :  { %v280_v59 = vsub.s32 0, %v278_v56  ;;  %v171_v60 = vadd.s32 536870912, %v170_v58  ;;  %v307_v45 = vadd.s32 3, %v303_v36 }
 0x10a   :  { %v344_v61 = vmin.u32 %v280_v59, %v278_v56  ;;  %v172_v62 = vshrl.u32 %v171_v60, 30  ;;  %v308_v49 = vand.u32 3, %v307_v45 }
 0x10c   :  { %v282_v63 = vclz %v344_v61  ;;  %v173_v0 = vshll.u32 %v172_v62, 30  ;;  %v196_v44 = vsub.s32 4, %v172_v62  ;;  %vm313_vm3 = vcmp.eq.s32.totalorder %v308_v49, 2 }
 0x10d   :  { %vm310_vm4 = vcmp.eq.s32.totalorder %v308_v49, 0  ;;  %vm309_vm5 = vcmp.lt.s32.totalorder %v308_v49, 2 }
 0x10e   :  { %v345_v1 = vadd.s32 4294967294, %v282_v63  ;;  %v174_v2 = vsub.s32 %v170_v58, %v173_v0  ;;  %v197_v47 = vsel %vm112_vm1, %v196_v44, %v172_v62 }
 0x10f   :  { %v199_v51 = vsel %vm111_vm2, 0, %v197_v47 }
 0x110   :  { %vm346_vm13 = vcmp.lt.s32.totalorder %v345_v1, 0  ;;  %v176_v4 = vsub.s32 0, %v174_v2  ;;  %v203_v55 = vadd.s32 3, %v199_v51 }
 0x111   :  { %v285_v3 = vsel %vm346_vm13, 0, %v345_v1 }
 0x112   :  { %v286_v6 = vsub.s32 32, %v285_v3  ;;  %v290_v7 = vsub.s32 4294967266, %v285_v3  ;;  %v340_v8 = vmin.u32 %v176_v4, %v174_v2  ;;  %v287_v9 = vshll.u32 %v278_v56, %v285_v3 }
 0x113   :  { %v204_v58 = vand.u32 3, %v203_v55 }
 0x114   :  { %v288_v11 = vshrl.u32 %v270_v5, %v286_v6  ;;  %v291_v16 = vadd.s32 127, %v290_v7  ;;  %v178_v17 = vclz %v340_v8 }
 0x115   :  { %vm209_vm7 = vcmp.eq.s32.totalorder %v204_v58, 2  ;;  %vm206_vm8 = vcmp.eq.s32.totalorder %v204_v58, 0  ;;  %vm205_vm9 = vcmp.lt.s32.totalorder %v204_v58, 2 }
 0x116   :  { %v289_v19 = vor.u32 %v288_v11, %v287_v9  ;;  %v292_v20 = vshll.u32 %v291_v16, 23  ;;  %v341_v21 = vadd.s32 4294967294, %v178_v17 }
 0x118   :  { %v293_v22 = vor.u32 4788187, %v292_v20  ;;  %vm342_vm14 = vcmp.lt.s32.totalorder %v341_v21, 0  ;;  %v296_v24 = vcvt.s32.f32 %v289_v19 }
 0x119   :  { %v181_v25 = vsel %vm342_vm14, 0, %v341_v21 }
 0x11a   :  { %v294_v23 = vand.u32 2147483647, %v293_v22  ;;  %v182_v27 = vsub.s32 32, %v181_v25  ;;  %v186_v28 = vsub.s32 4294967266, %v181_v25  ;;  %v183_v29 = vshll.u32 %v174_v2, %v181_v25 }
 0x11c   :  { %v297_v14 = vmul.f32 %v296_v24, %v294_v23  ;;  %v184_v32 = vshrl.u32 %v166_v26, %v182_v27  ;;  %v187_v34 = vadd.s32 127, %v186_v28 }
 0x11e   :  { %v298_v37 = vxor.u32 2147483648, %v297_v14  ;;  %v185_v38 = vor.u32 %v184_v32, %v183_v29  ;;  %v188_v31 = vshll.u32 %v187_v34, 23 }
 0x120   :  { %v299_v39 = vsel %vm216_vm15, %v298_v37, %v297_v14  ;;  %v189_v40 = vor.u32 4788187, %v188_v31  ;;  %v192_v42 = vcvt.s32.f32 %v185_v38 }
 0x121   :  { %v302_v33 = vsel %vm215_vm0, %v471_v10, %v299_v39 }
 0x122   :  { %389 = vcosq.f32 %v302_v33  ;;  %v190_v41 = vand.u32 2147483647, %v189_v40 }
 0x123   :  { %391 = vsinq.f32 %v302_v33 }
 0x124   :  { %v193_v43 = vmul.f32 %v192_v42, %v190_v41 }
 0x126   :  { %v194_v46 = vxor.u32 2147483648, %v193_v43 }
 0x128   :  { %v195_v13 = vsel %vm112_vm1, %v194_v46, %v193_v43 }
 0x129   :  { %v198_v48 = vsel %vm111_vm2, %v473_v12, %v195_v13 }
 0x12a   :  { %393 = vcosq.f32 %v198_v48 }
 0x12b   :  { %395 = vsinq.f32 %v198_v48 }
 0x12c   :  { %v390_v50 = vpop.eup %389 }
 0x12d   :  { %v392_v52 = vpop.eup %391  ;;  %v314_v53 = vxor.u32 2147483648, %v390_v50 }
 0x12e   :  { %v311_v54 = vxor.u32 2147483648, %v392_v52 }
 0x12f   :  { %v315_v35 = vsel %vm313_vm3, %v314_v53, %v392_v52 }
 0x130   :  { %v312_v56 = vsel %vm310_vm4, %v390_v50, %v311_v54 }
 0x131   :  { %v316_v18 = vsel %vm309_vm5, %v312_v56, %v315_v35 }
 0x132   :  { %v317_v57 = vsel %vm306_vm6, nan, %v316_v18 }
 0x133   :  { %319 = vst [vmem:[#allocation2 + $0x8] sm:$0xff] %v317_v57 }
 0x134   :  { %v394_v59 = vpop.eup %393 }
 0x135   :  { %v396_v60 = vpop.eup %395  ;;  %v210_v61 = vxor.u32 2147483648, %v394_v59 }
 0x136   :  { %v207_v62 = vxor.u32 2147483648, %v396_v60 }
 0x137   :  { %v211_v63 = vsel %vm209_vm7, %v210_v61, %v396_v60 }
 0x138   :  { %v208_v0 = vsel %vm206_vm8, %v394_v59, %v207_v62 }
 0x139   :  { %v212_v1 = vsel %vm205_vm9, %v208_v0, %v211_v63 }
 0x13a   :  { %v213_v10 = vsel %vm202_vm10, nan, %v212_v1 }
 0x13b   :  { %318 = vst [vmem:[#allocation2] sm:$0xff] %v213_v10 }
 0x13c   :  { %408 = shalt.err (!%p405_p4)
}
 0x13d   :  { %s409_s28 = scalar_lea.hbm %s548_s3, 256 }
 0x13e   :  { %p410_p5 = scmp.ne.s32.totalorder %s548_s3, %s409_s28  ;;  %p413_p6 = scmp.lt.u32.totalorder %s409_s28, %s548_s3 }
 0x140   :  { %p415_p7 = pnand %p413_p6, %p410_p5 }
 0x142   :  { %418 = shalt.err (!%p415_p7)
}
 0x143   :  { %s428_s6 = smov 128   ;;  %s429_s7 = smov 8  }
 0x144   :  { %331 = dma.vmem_to_hbm [thread:$0]  %s326_s1, 256, %s548_s3, [#allocation3], %s428_s6, %s428_s6, %s429_s7  }
 0x145   :  { %419 = dma.done.wait [#allocation3], 256  }
 0x146   :  { %420 = vsyncadd [#allocation3], 4294967040 }
 0x147   :  { %335 = vsyncpa [#allocation3], 1 }

</bundles_post_ra>
